<compile_context>
chip_gen: v5e
topology: v5e:2x2
jax: 0.10.0
libtpu: 0.0.40
codegen_flags: <defaults>
</compile_context>

<pallas_src>
import jax
import jax.numpy as jnp
from jax.experimental import pallas as pl
from jax.experimental.pallas import tpu as pltpu

LAMBDA_G = 35.0
U_A = 110.0

# Focal-head order: spectacles, facial_hair, pose, emotion, gender
_HEAD_ALPHA0 = (0.28, 0.30, 0.0263, 0.232, 0.916)
_HEAD_ALPHA1 = (0.72, 0.70, 0.9737, 0.768, 0.084)
_HEAD_GAMMA0 = (0.0, 0.0, 0.0, 0.0, 2.0)
_HEAD_GAMMA1 = (1.0, 1.0, 2.5, 1.0, 0.0)

_LANE_W = 128
_FOC_LANE0 = 8          # the five focal head losses live at output lanes 8..12


def _round_up(x, m):
    return (x + m - 1) // m * m


def _pick_b_tile(B, row_align):
    """Batch tile: large (up to 256), aligned to the sublane packing of the
    logits dtype, and split so nb >= 2 when the batch is big enough (keeps both
    v7x TensorCores busy on the 'parallel' batch axis)."""
    if B >= 512:
        return 256
    if B >= 2 * row_align:
        return _round_up(_round_up(B, row_align) // 2, row_align)
    return _round_up(B, row_align)


# ---------------------------------------------------------------------------
# Fused kernel: class-weighted CE (online LSE over class tiles) + MagFace reg
# partials per batch tile, with the five binary focal heads folded in.
# ---------------------------------------------------------------------------
def _fused_loss_kernel(logits_ref, side_ref, foc_ref, out_ref, m_run, l_run):
    c = pl.program_id(1)
    nc = pl.num_programs(1)

    # ---- hot loop: online log-sum-exp over the class axis ----
    @pl.when(c == 0)
    def _():
        m_run[...] = jnp.full_like(m_run, -jnp.inf)
        l_run[...] = jnp.zeros_like(l_run)

    x = logits_ref[...].astype(jnp.float32)                        # [Bt, Ct]
    m_new = jnp.maximum(m_run[...], jnp.max(x, axis=-1, keepdims=True))
    l_run[...] = (l_run[...] * jnp.exp(m_run[...] - m_new)
                  + jnp.sum(jnp.exp(x - m_new), axis=-1, keepdims=True))
    m_run[...] = m_new

    # ---- finalize this batch tile: weighted-CE + MagFace partial sums ----
    @pl.when(c == nc - 1)
    def _():
        side = side_ref[...].astype(jnp.float32)                   # [Bt, 4]
        xt = side[:, 0:1]                                          # target logit
        wt = side[:, 1:2]                                          # target class weight
        a = jnp.maximum(side[:, 2:3], 1e-6)                        # feature norm
        valid = side[:, 3:4]                                       # 0 for padded rows

        lse = m_run[...] + jnp.log(l_run[...])
        nll = lse - xt
        num = jnp.sum(wt * nll, axis=0, keepdims=True)             # [1, 1]
        den = jnp.sum(wt, axis=0, keepdims=True)                   # [1, 1]
        g = (a * (1.0 / (U_A * U_A)) + 1.0 / a) * valid            # MagFace g(a)
        reg = jnp.sum(g, axis=0, keepdims=True)                    # [1, 1]

        lane = jax.lax.broadcasted_iota(jnp.int32, (1, _LANE_W), 1)
        out_ref[0] = (jnp.where(lane == 0, num, 0.0)
                      + jnp.where(lane == 1, den, 0.0)
                      + jnp.where(lane == 2, reg, 0.0))            # lane-dense row

    # ---- five binary focal heads (tiny); executed on a single grid step ----
    @pl.when((c == nc - 1) & (pl.program_id(0) == 0))
    def _():
        foc = foc_ref[...].astype(jnp.float32)                     # [Bf, 384]
        z = foc[:, 0:_LANE_W]                                      # margin to target
        alpha_t = foc[:, _LANE_W:2 * _LANE_W]
        gamma_t = foc[:, 2 * _LANE_W:3 * _LANE_W]
        # log p_t = log sigmoid(z): exact, stable 2-class softmax of the target
        logp = jnp.minimum(z, 0.0) - jnp.log(1.0 + jnp.exp(-jnp.abs(z)))
        p = jnp.exp(logp)
        om = 1.0 - p
        om2 = om * om
        # gamma in {0, 1, 2, 2.5}: closed forms, no exp(gamma*log(1-p))
        factor = jnp.where(gamma_t == 0.0, 1.0,
                 jnp.where(gamma_t == 1.0, om,
                 jnp.where(gamma_t == 2.0, om2, om2 * jnp.sqrt(om))))
        floss = -alpha_t * factor * logp       # zero on unused lanes (alpha == 0)
        foc_row = jnp.sum(floss, axis=0, keepdims=True) / float(foc.shape[0])
        out_ref[0] = out_ref[0] + foc_row      # heads land on lanes 8..12


def _id_multitask_pallas(id_logits, side, foc):
    B, C = id_logits.shape
    row_align = 16 if id_logits.dtype == jnp.bfloat16 else 8
    b_tile = _pick_b_tile(B, row_align)
    b_pad = _round_up(B, b_tile)
    c_tile = min(2048, _round_up(C, 128))
    c_pad = _round_up(C, c_tile)
    nb, nc = b_pad // b_tile, c_pad // c_tile

    x = id_logits
    if c_pad != C:   # dtype-aware pad value; padded classes never win the max
        x = jnp.pad(x, ((0, 0), (0, c_pad - C)),
                    constant_values=float(jnp.finfo(x.dtype).min))
    if b_pad != B:   # padded rows: xt = wt = a = valid = 0 -> contribute nothing
        x = jnp.pad(x, ((0, b_pad - B), (0, 0)))
        side = jnp.pad(side, ((0, b_pad - B), (0, 0)))

    Bf = foc.shape[0]
    parts = pl.pallas_call(
        _fused_loss_kernel,
        out_shape=jax.ShapeDtypeStruct((nb, 1, _LANE_W), jnp.float32),
        grid=(nb, nc),
        in_specs=[
            pl.BlockSpec((b_tile, c_tile), lambda b, c: (b, c)),   # id logits
            pl.BlockSpec((b_tile, 4), lambda b, c: (b, 0)),        # side info
            pl.BlockSpec((Bf, 3 * _LANE_W), lambda b, c: (0, 0)),  # focal slab
        ],
        out_specs=pl.BlockSpec((1, 1, _LANE_W), lambda b, c: (b, 0, 0)),
        scratch_shapes=[pltpu.VMEM((b_tile, 1), jnp.float32),      # m_run
                        pltpu.VMEM((b_tile, 1), jnp.float32)],     # l_run
        compiler_params=pltpu.CompilerParams(
            dimension_semantics=("parallel", "arbitrary")),
    )(x, side, foc)
    return parts


# ---------------------------------------------------------------------------
# ConcatMultiTaskLoss (forward)
# ---------------------------------------------------------------------------
@jax.jit
def concat_multi_task_loss(logits, y, id_class_weights, loss_weight):
    (x_spectacles, x_facial_hair, x_pose, x_emotion, x_gender,
     x_id_logits, x_id_norm) = logits

    B, _ = x_id_logits.shape
    id_t = y[:, 0].astype(jnp.int32)

    # --- id-head side info: target gathers hoisted out of the kernel ---
    xt = jnp.take_along_axis(x_id_logits, id_t[:, None], axis=1).astype(jnp.float32)
    wt = id_class_weights.astype(jnp.float32)[id_t][:, None]
    a = x_id_norm.astype(jnp.float32)[:, None]
    valid = jnp.ones((B, 1), jnp.float32)
    side = jnp.concatenate([xt, wt, a, valid], axis=1)             # [B, 4]

    # --- focal-head operands, packed lane-dense at lanes 8..12 ---
    # target order: spectacles, facial_hair, pose, emotion, gender
    tc = jnp.stack([y[:, 2], y[:, 3], y[:, 4], y[:, 5], y[:, 1]],
                   axis=1).astype(jnp.int32)                       # [B, 5]
    xs = jnp.stack([x_spectacles, x_facial_hair, x_pose, x_emotion,
                    x_gender], axis=1).astype(jnp.float32)         # [B, 5, 2]
    is1 = tc == 1
    delta = xs[..., 1] - xs[..., 0]
    z = jnp.where(is1, delta, -delta)                              # margin to target
    alpha_t = jnp.where(is1, jnp.asarray(_HEAD_ALPHA1, jnp.float32),
                        jnp.asarray(_HEAD_ALPHA0, jnp.float32))
    gamma_t = jnp.where(is1, jnp.asarray(_HEAD_GAMMA1, jnp.float32),
                        jnp.asarray(_HEAD_GAMMA0, jnp.float32))

    def lanepack(v):                       # [B,5] -> [B,128], heads at lanes 8..12
        return jnp.zeros((B, _LANE_W), jnp.float32).at[
            :, _FOC_LANE0:_FOC_LANE0 + 5].set(v)

    foc = jnp.concatenate([lanepack(z), lanepack(alpha_t), lanepack(gamma_t)],
                          axis=1)                                  # [B, 384]

    parts = _id_multitask_pallas(x_id_logits, side, foc)           # [nb, 1, 128]
    tot = jnp.sum(parts[:, 0, :], axis=0)                          # [128]

    loss_id = tot[0] / tot[1] + LAMBDA_G * (tot[2] / float(B))
    loss_spectacles = tot[_FOC_LANE0 + 0]
    loss_facial_hair = tot[_FOC_LANE0 + 1]
    loss_pose = tot[_FOC_LANE0 + 2]
    loss_emotion = tot[_FOC_LANE0 + 3]
    loss_gender = tot[_FOC_LANE0 + 4]

    total_loss = (loss_id * loss_weight['loss_id_weight']
                  + loss_gender * loss_weight['loss_gender_weight']
                  + loss_emotion * loss_weight['loss_emotion_weight']
                  + loss_pose * loss_weight['loss_pose_weight']
                  + loss_facial_hair * loss_weight['loss_facial_hair_weight']
                  + loss_spectacles * loss_weight['loss_spectacles_weight'])

    return (total_loss, loss_id, loss_gender, loss_emotion, loss_pose,
            loss_facial_hair, loss_spectacles)


# ---------------------------------------------------------------------------
# Demo
# ---------------------------------------------------------------------------
if __name__ == "__main__":
    B = 32           # batch (b_tile=16 -> nb=2, exercises the parallel axis)
    NUM_ID = 4096    # identity classes (c_tile=2048 -> nc=2, exercises online LSE)

    key = jax.random.PRNGKey(0)
    keys = jax.random.split(key, 9)

    x_spectacles = jax.random.normal(keys[0], (B, 2), dtype=jnp.float32)
    x_facial_hair = jax.random.normal(keys[1], (B, 2), dtype=jnp.float32)
    x_pose = jax.random.normal(keys[2], (B, 2), dtype=jnp.float32)
    x_emotion = jax.random.normal(keys[3], (B, 2), dtype=jnp.float32)
    x_gender = jax.random.normal(keys[4], (B, 2), dtype=jnp.float32)
    x_id_logits = jax.random.normal(keys[5], (B, NUM_ID), dtype=jnp.float32)
    x_id_norm = jax.random.uniform(keys[6], (B,), dtype=jnp.float32,
                                   minval=15.0, maxval=100.0)

    id_labels = jax.random.randint(keys[7], (B, 1), 0, NUM_ID)
    bin_labels = jax.random.randint(keys[8], (B, 5), 0, 2)
    y = jnp.concatenate([id_labels, bin_labels], axis=1).astype(jnp.int32)

    # deterministic synthetic per-class weights (stand-in for the metadata file)
    id_class_weights = jnp.linspace(0.5, 1.5, NUM_ID, dtype=jnp.float32)

    loss_weight = {
        'loss_id_weight': 1.0,
        'loss_spectacles_weight': 0.2,
        'loss_facial_hair_weight': 0.2,
        'loss_pose_weight': 0.3,
        'loss_gender_weight': 0.5,
        'loss_emotion_weight': 0.4,
    }

    logits = (x_spectacles, x_facial_hair, x_pose, x_emotion, x_gender,
              x_id_logits, x_id_norm)

    out = concat_multi_task_loss(logits, y, id_class_weights, loss_weight)
    jax.block_until_ready(out)
    print("KERNEL_OK")
</pallas_src>

<mosaic_0001>
module attributes {stable_mosaic.version = 11 : i64} {
  func.func @_fused_loss_kernel(%arg0: i32, %arg1: i32, %arg2: memref<16x2048xf32, #tpu.memory_space<vmem>>, %arg3: memref<16x4xf32, #tpu.memory_space<vmem>>, %arg4: memref<32x384xf32, #tpu.memory_space<vmem>>, %arg5: memref<1x1x128xf32, #tpu.memory_space<vmem>>, %arg6: memref<16x1xf32, #tpu.memory_space<vmem>>, %arg7: memref<16x1xf32, #tpu.memory_space<vmem>>) attributes {dimension_semantics = [#tpu.dimension_semantics<parallel>, #tpu.dimension_semantics<arbitrary>], iteration_bounds = array<i64: 2, 2>, scalar_prefetch = 0 : i64, scratch_operands = 2 : i64, tpu.core_type = #tpu.core_type<tc>, window_params = [{transform_indices = @transform_0, window_bounds = array<i64: 16, 2048>}, {transform_indices = @transform_1, window_bounds = array<i64: 16, 4>}, {pipeline_mode = #tpu.pipeline_mode<synchronous>, transform_indices = @transform_2, window_bounds = array<i64: 32, 384>}, {transform_indices = @transform_3, window_bounds = array<i64: 1, 1, 128>}]} {
    %c0_i32 = arith.constant 0 : i32
    %0 = arith.cmpi eq, %arg1, %c0_i32 : i32
    %1 = arith.extui %0 : i1 to i32
    %c0_i32_0 = arith.constant 0 : i32
    %2 = arith.cmpi ne, %1, %c0_i32_0 : i32
    scf.if %2 {
      %cst_17 = arith.constant 0xFF800000 : f32
      %29 = vector.broadcast %cst_17 : f32 to vector<16x1xf32>
      %c0_18 = arith.constant 0 : index
      %c0_19 = arith.constant 0 : index
      %30 = vector.load %arg6[%c0_18, %c0_19] : memref<16x1xf32, #tpu.memory_space<vmem>>, vector<16x1xf32>
      tpu.vector_store %arg6[%c0_18, %c0_19], %29 {strides = array<i32>} : memref<16x1xf32, #tpu.memory_space<vmem>>, vector<16x1xf32>,
      %cst_20 = arith.constant 0.000000e+00 : f32
      %31 = vector.broadcast %cst_20 : f32 to vector<16x1xf32>
      %c0_21 = arith.constant 0 : index
      %c0_22 = arith.constant 0 : index
      %32 = vector.load %arg7[%c0_21, %c0_22] : memref<16x1xf32, #tpu.memory_space<vmem>>, vector<16x1xf32>
      tpu.vector_store %arg7[%c0_21, %c0_22], %31 {strides = array<i32>} : memref<16x1xf32, #tpu.memory_space<vmem>>, vector<16x1xf32>,
    } else {
    }
    %c0 = arith.constant 0 : index
    %c0_1 = arith.constant 0 : index
    %3 = vector.load %arg2[%c0, %c0_1] : memref<16x2048xf32, #tpu.memory_space<vmem>>, vector<16x2048xf32>
    %c0_2 = arith.constant 0 : index
    %c0_3 = arith.constant 0 : index
    %4 = vector.load %arg6[%c0_2, %c0_3] : memref<16x1xf32, #tpu.memory_space<vmem>>, vector<16x1xf32>
    %cst = arith.constant dense<0xFF800000> : vector<16xf32>
    %5 = vector.multi_reduction <maximumf>, %3, %cst [1] : vector<16x2048xf32> to vector<16xf32>
    %6 = vector.shape_cast %5 : vector<16xf32> to vector<16x1xf32>
    %7 = arith.maximumf %4, %6 : vector<16x1xf32>
    %c0_4 = arith.constant 0 : index
    %c0_5 = arith.constant 0 : index
    %8 = vector.load %arg7[%c0_4, %c0_5] : memref<16x1xf32, #tpu.memory_space<vmem>>, vector<16x1xf32>
    %c0_6 = arith.constant 0 : index
    %c0_7 = arith.constant 0 : index
    %9 = vector.load %arg6[%c0_6, %c0_7] : memref<16x1xf32, #tpu.memory_space<vmem>>, vector<16x1xf32>
    %10 = arith.subf %9, %7 : vector<16x1xf32>
    %11 = math.exp %10 : vector<16x1xf32>
    %12 = arith.mulf %8, %11 : vector<16x1xf32>
    %13 = vector.broadcast %7 : vector<16x1xf32> to vector<16x2048xf32>
    %14 = arith.subf %3, %13 : vector<16x2048xf32>
    %15 = math.exp %14 : vector<16x2048xf32>
    %cst_8 = arith.constant dense<0.000000e+00> : vector<16xf32>
    %16 = vector.multi_reduction <add>, %15, %cst_8 [1] : vector<16x2048xf32> to vector<16xf32>
    %17 = vector.shape_cast %16 : vector<16xf32> to vector<16x1xf32>
    %18 = arith.addf %12, %17 : vector<16x1xf32>
    %c0_9 = arith.constant 0 : index
    %c0_10 = arith.constant 0 : index
    %19 = vector.load %arg7[%c0_9, %c0_10] : memref<16x1xf32, #tpu.memory_space<vmem>>, vector<16x1xf32>
    tpu.vector_store %arg7[%c0_9, %c0_10], %18 {strides = array<i32>} : memref<16x1xf32, #tpu.memory_space<vmem>>, vector<16x1xf32>,
    %c0_11 = arith.constant 0 : index
    %c0_12 = arith.constant 0 : index
    %20 = vector.load %arg6[%c0_11, %c0_12] : memref<16x1xf32, #tpu.memory_space<vmem>>, vector<16x1xf32>
    tpu.vector_store %arg6[%c0_11, %c0_12], %7 {strides = array<i32>} : memref<16x1xf32, #tpu.memory_space<vmem>>, vector<16x1xf32>,
    %c1_i32 = arith.constant 1 : i32
    %21 = arith.cmpi eq, %arg1, %c1_i32 : i32
    %22 = arith.extui %21 : i1 to i32
    %c0_i32_13 = arith.constant 0 : i32
    %23 = arith.cmpi ne, %22, %c0_i32_13 : i32
    scf.if %23 {
      %c0_17 = arith.constant 0 : index
      %c0_18 = arith.constant 0 : index
      %29 = vector.load %arg3[%c0_17, %c0_18] : memref<16x4xf32, #tpu.memory_space<vmem>>, vector<16x4xf32>
      %30 = vector.extract_strided_slice %29 {offsets = [0, 0], sizes = [16, 1], strides = [1, 1]} : vector<16x4xf32> to vector<16x1xf32>
      %31 = vector.extract_strided_slice %29 {offsets = [0, 1], sizes = [16, 1], strides = [1, 1]} : vector<16x4xf32> to vector<16x1xf32>
      %32 = vector.extract_strided_slice %29 {offsets = [0, 2], sizes = [16, 1], strides = [1, 1]} : vector<16x4xf32> to vector<16x1xf32>
      %cst_19 = arith.constant 9.99999997E-7 : f32
      %33 = vector.broadcast %cst_19 : f32 to vector<16x1xf32>
      %34 = arith.maximumf %32, %33 : vector<16x1xf32>
      %35 = vector.extract_strided_slice %29 {offsets = [0, 3], sizes = [16, 1], strides = [1, 1]} : vector<16x4xf32> to vector<16x1xf32>
      %c0_20 = arith.constant 0 : index
      %c0_21 = arith.constant 0 : index
      %36 = vector.load %arg6[%c0_20, %c0_21] : memref<16x1xf32, #tpu.memory_space<vmem>>, vector<16x1xf32>
      %c0_22 = arith.constant 0 : index
      %c0_23 = arith.constant 0 : index
      %37 = vector.load %arg7[%c0_22, %c0_23] : memref<16x1xf32, #tpu.memory_space<vmem>>, vector<16x1xf32>
      %38 = math.log %37 : vector<16x1xf32>
      %39 = arith.addf %36, %38 : vector<16x1xf32>
      %40 = arith.subf %39, %30 : vector<16x1xf32>
      %41 = arith.mulf %31, %40 : vector<16x1xf32>
      %cst_24 = arith.constant dense<0.000000e+00> : vector<1xf32>
      %42 = vector.multi_reduction <add>, %41, %cst_24 [0] : vector<16x1xf32> to vector<1xf32>
      %43 = vector.shape_cast %42 : vector<1xf32> to vector<1x1xf32>
      %cst_25 = arith.constant dense<0.000000e+00> : vector<1xf32>
      %44 = vector.multi_reduction <add>, %31, %cst_25 [0] : vector<16x1xf32> to vector<1xf32>
      %45 = vector.shape_cast %44 : vector<1xf32> to vector<1x1xf32>
      %cst_26 = arith.constant 8.26446266E-5 : f32
      %46 = vector.broadcast %cst_26 : f32 to vector<16x1xf32>
      %47 = arith.mulf %34, %46 : vector<16x1xf32>
      %cst_27 = arith.constant 1.000000e+00 : f32
      %48 = vector.broadcast %cst_27 : f32 to vector<16x1xf32>
      %49 = arith.divf %48, %34 : vector<16x1xf32>
      %50 = arith.addf %47, %49 : vector<16x1xf32>
      %51 = arith.mulf %50, %35 : vector<16x1xf32>
      %cst_28 = arith.constant dense<0.000000e+00> : vector<1xf32>
      %52 = vector.multi_reduction <add>, %51, %cst_28 [0] : vector<16x1xf32> to vector<1xf32>
      %53 = vector.shape_cast %52 : vector<1xf32> to vector<1x1xf32>
      %54 = tpu.iota {dimensions = array<i32: 1>} : vector<1x128xi32>
      %c0_i32_29 = arith.constant 0 : i32
      %55 = vector.broadcast %c0_i32_29 : i32 to vector<1x128xi32>
      %56 = arith.cmpi eq, %54, %55 : vector<1x128xi32>
      %cst_30 = arith.constant 0.000000e+00 : f32
      %57 = vector.shape_cast %43 : vector<1x1xf32> to vector<1x1xf32>
      %58 = vector.broadcast %57 : vector<1x1xf32> to vector<1x128xf32>
      %59 = vector.broadcast %cst_30 : f32 to vector<1x128xf32>
      %60 = arith.select %56, %58, %59 : vector<1x128xi1>, vector<1x128xf32>
      %c1_i32_31 = arith.constant 1 : i32
      %61 = vector.broadcast %c1_i32_31 : i32 to vector<1x128xi32>
      %62 = arith.cmpi eq, %54, %61 : vector<1x128xi32>
      %cst_32 = arith.constant 0.000000e+00 : f32
      %63 = vector.shape_cast %45 : vector<1x1xf32> to vector<1x1xf32>
      %64 = vector.broadcast %63 : vector<1x1xf32> to vector<1x128xf32>
      %65 = vector.broadcast %cst_32 : f32 to vector<1x128xf32>
      %66 = arith.select %62, %64, %65 : vector<1x128xi1>, vector<1x128xf32>
      %67 = arith.addf %60, %66 : vector<1x128xf32>
      %c2_i32 = arith.constant 2 : i32
      %68 = vector.broadcast %c2_i32 : i32 to vector<1x128xi32>
      %69 = arith.cmpi eq, %54, %68 : vector<1x128xi32>
      %cst_33 = arith.constant 0.000000e+00 : f32
      %70 = vector.shape_cast %53 : vector<1x1xf32> to vector<1x1xf32>
      %71 = vector.broadcast %70 : vector<1x1xf32> to vector<1x128xf32>
      %72 = vector.broadcast %cst_33 : f32 to vector<1x128xf32>
      %73 = arith.select %69, %71, %72 : vector<1x128xi1>, vector<1x128xf32>
      %74 = arith.addf %67, %73 : vector<1x128xf32>
      %c0_34 = arith.constant 0 : index
      %c0_35 = arith.constant 0 : index
      %c0_36 = arith.constant 0 : index
      %75 = vector.load %arg5[%c0_34, %c0_35, %c0_36] : memref<1x1x128xf32, #tpu.memory_space<vmem>>, vector<1x1x128xf32>
      %76 = vector.shape_cast %75 : vector<1x1x128xf32> to vector<1x128xf32>
      %77 = vector.shape_cast %74 : vector<1x128xf32> to vector<1x1x128xf32>
      tpu.vector_store %arg5[%c0_34, %c0_35, %c0_36], %77 {strides = array<i32>} : memref<1x1x128xf32, #tpu.memory_space<vmem>>, vector<1x1x128xf32>,
    } else {
    }
    %c1_i32_14 = arith.constant 1 : i32
    %24 = arith.cmpi eq, %arg1, %c1_i32_14 : i32
    %c0_i32_15 = arith.constant 0 : i32
    %25 = arith.cmpi eq, %arg0, %c0_i32_15 : i32
    %26 = arith.andi %24, %25 : i1
    %27 = arith.extui %26 : i1 to i32
    %c0_i32_16 = arith.constant 0 : i32
    %28 = arith.cmpi ne, %27, %c0_i32_16 : i32
    scf.if %28 {
      %c0_17 = arith.constant 0 : index
      %c0_18 = arith.constant 0 : index
      %29 = vector.load %arg4[%c0_17, %c0_18] : memref<32x384xf32, #tpu.memory_space<vmem>>, vector<32x384xf32>
      %30 = vector.extract_strided_slice %29 {offsets = [0, 0], sizes = [32, 128], strides = [1, 1]} : vector<32x384xf32> to vector<32x128xf32>
      %31 = vector.extract_strided_slice %29 {offsets = [0, 128], sizes = [32, 128], strides = [1, 1]} : vector<32x384xf32> to vector<32x128xf32>
      %32 = vector.extract_strided_slice %29 {offsets = [0, 256], sizes = [32, 128], strides = [1, 1]} : vector<32x384xf32> to vector<32x128xf32>
      %cst_19 = arith.constant 0.000000e+00 : f32
      %33 = vector.broadcast %cst_19 : f32 to vector<32x128xf32>
      %34 = arith.minimumf %30, %33 : vector<32x128xf32>
      %35 = math.absf %30 : vector<32x128xf32>
      %cst_20 = arith.constant 0.000000e+00 : f32
      %36 = vector.broadcast %cst_20 : f32 to vector<32x128xf32>
      %37 = arith.subf %36, %35 : vector<32x128xf32>
      %38 = math.exp %37 : vector<32x128xf32>
      %cst_21 = arith.constant 1.000000e+00 : f32
      %39 = vector.broadcast %cst_21 : f32 to vector<32x128xf32>
      %40 = arith.addf %39, %38 : vector<32x128xf32>
      %41 = math.log %40 : vector<32x128xf32>
      %42 = arith.subf %34, %41 : vector<32x128xf32>
      %43 = math.exp %42 : vector<32x128xf32>
      %cst_22 = arith.constant 1.000000e+00 : f32
      %44 = vector.broadcast %cst_22 : f32 to vector<32x128xf32>
      %45 = arith.subf %44, %43 : vector<32x128xf32>
      %46 = arith.mulf %45, %45 : vector<32x128xf32>
      %cst_23 = arith.constant 0.000000e+00 : f32
      %47 = vector.broadcast %cst_23 : f32 to vector<32x128xf32>
      %48 = arith.cmpf oeq, %32, %47 : vector<32x128xf32>
      %cst_24 = arith.constant 1.000000e+00 : f32
      %49 = vector.broadcast %cst_24 : f32 to vector<32x128xf32>
      %50 = arith.cmpf oeq, %32, %49 : vector<32x128xf32>
      %cst_25 = arith.constant 2.000000e+00 : f32
      %51 = vector.broadcast %cst_25 : f32 to vector<32x128xf32>
      %52 = arith.cmpf oeq, %32, %51 : vector<32x128xf32>
      %53 = math.sqrt %45 : vector<32x128xf32>
      %54 = arith.mulf %46, %53 : vector<32x128xf32>
      %55 = arith.select %52, %46, %54 : vector<32x128xi1>, vector<32x128xf32>
      %56 = arith.select %50, %45, %55 : vector<32x128xi1>, vector<32x128xf32>
      %cst_26 = arith.constant 1.000000e+00 : f32
      %57 = vector.broadcast %cst_26 : f32 to vector<32x128xf32>
      %58 = arith.select %48, %57, %56 : vector<32x128xi1>, vector<32x128xf32>
      %cst_27 = arith.constant 0.000000e+00 : f32
      %59 = vector.broadcast %cst_27 : f32 to vector<32x128xf32>
      %60 = arith.subf %59, %31 : vector<32x128xf32>
      %61 = arith.mulf %60, %58 : vector<32x128xf32>
      %62 = arith.mulf %61, %42 : vector<32x128xf32>
      %cst_28 = arith.constant dense<0.000000e+00> : vector<128xf32>
      %63 = vector.multi_reduction <add>, %62, %cst_28 [0] : vector<32x128xf32> to vector<128xf32>
      %64 = vector.shape_cast %63 : vector<128xf32> to vector<1x128xf32>
      %cst_29 = arith.constant 3.200000e+01 : f32
      %65 = vector.broadcast %cst_29 : f32 to vector<1x128xf32>
      %66 = arith.divf %64, %65 : vector<1x128xf32>
      %c0_30 = arith.constant 0 : index
      %c0_31 = arith.constant 0 : index
      %c0_32 = arith.constant 0 : index
      %67 = vector.load %arg5[%c0_30, %c0_31, %c0_32] : memref<1x1x128xf32, #tpu.memory_space<vmem>>, vector<1x1x128xf32>
      %68 = vector.shape_cast %67 : vector<1x1x128xf32> to vector<1x128xf32>
      %69 = arith.addf %68, %66 : vector<1x128xf32>
      %c0_33 = arith.constant 0 : index
      %c0_34 = arith.constant 0 : index
      %c0_35 = arith.constant 0 : index
      %70 = vector.load %arg5[%c0_33, %c0_34, %c0_35] : memref<1x1x128xf32, #tpu.memory_space<vmem>>, vector<1x1x128xf32>
      %71 = vector.shape_cast %70 : vector<1x1x128xf32> to vector<1x128xf32>
      %72 = vector.shape_cast %69 : vector<1x128xf32> to vector<1x1x128xf32>
      tpu.vector_store %arg5[%c0_33, %c0_34, %c0_35], %72 {strides = array<i32>} : memref<1x1x128xf32, #tpu.memory_space<vmem>>, vector<1x1x128xf32>,
    } else {
    }
    return
  }
  func.func @transform_0(%arg0: i32, %arg1: i32) -> (i32, i32) {
    %c0_i32 = arith.constant 0 : i32
    return %arg0, %arg1 : i32, i32
  }
  func.func @transform_1(%arg0: i32, %arg1: i32) -> (i32, i32) {
    %c0_i32 = arith.constant 0 : i32
    %c0_i32_0 = arith.constant 0 : i32
    return %arg0, %c0_i32 : i32, i32
  }
  func.func @transform_2(%arg0: i32, %arg1: i32) -> (i32, i32) {
    %c0_i32 = arith.constant 0 : i32
    %c0_i32_0 = arith.constant 0 : i32
    %c0_i32_1 = arith.constant 0 : i32
    return %c0_i32, %c0_i32_0 : i32, i32
  }
  func.func @transform_3(%arg0: i32, %arg1: i32) -> (i32, i32, i32) {
    %c0_i32 = arith.constant 0 : i32
    %c0_i32_0 = arith.constant 0 : i32
    %c0_i32_1 = arith.constant 0 : i32
    return %arg0, %c0_i32, %c0_i32_0 : i32, i32, i32
  }
}

</mosaic_0001>

<bundles_post_ra>
// kernel: concat_multi_task_loss.1
= control target key start
LH: loop header
LB: loop body
LE: loop exit
PB: predicated region body
PF: predicated region fallthrough
CT: control target
= control target key end

     0   :  { %s1191_s12 = smov 0   ;;  %s1193_s13 = smov 0   ;;  %s1773_s0 = inlined_call_operand.vmem [shape: f32[32,4096], index: 0, kind: input, shape index: {}]   ;;  %s1774_s1 = inlined_call_operand.vmem [shape: f32[32,4], index: 1, kind: input, shape index: {}]   ;;  %s1775_s2 = inlined_call_operand.vmem [shape: f32[32,384], index: 2, kind: input, shape index: {}]   ;;  %s1776_s3 = inlined_call_operand.vmem [shape: f32[2,1,128], index: 3, kind: output, shape index: {}]  }
   0x1   :  { %s1195_s14 = smov 0   ;;  %s1197_s15 = smov 0  }
   0x2   :  { %s1199_s16 = smov 0   ;;  %s1201_s17 = smov 0  }
   0x3   :  { %s1203_s18 = smov 0  }
   0x4 LB: > { %s22_s19 = sadd.s32 1, %s1153_s16  ;;  %s25_s20 = sadd.s32 1, %s1157_s17  ;;  %s1161_s18 = sphi %s1203_s18, %s13_s18   ;;  %s1157_s17 = sphi %s1201_s17, %s1787_s17   ;;  %s1153_s16 = sphi %s1199_s16, %s1786_s16   ;;  %s1149_s15 = sphi %s1197_s15, %s1785_s15   ;;  %s1145_s14 = sphi %s1195_s14, %s1784_s14   ;;  %s1141_s13 = sphi %s1193_s13, %s1783_s13   ;;  %s1137_s12 = sphi %s1191_s12, %s1782_s12  }
   0x5   : > { %p23_p0 = scmp.ge.s32.totalorder %s22_s19, 2  ;;  %p41_p1 = scmp.ne.s32.totalorder %s1141_s13, %s1137_s12 }
   0x6   : > { %p42_p2 = scmp.eq.s32.totalorder %s1161_s18, 0  ;;  %s34_s24 = sadd.s32 1, %s1141_s13 }
   0x7   : > { %s1789_s19 = smov (%p23_p0, %s22_s19), 0  ;;  %s1791_s20 = smov (!%p23_p0, %s25_s20), %s1157_s17 }
   0x8   : > { %p43_p3 = por %p42_p2, %p41_p1  ;;  %p27_p4 = scmp.ge.s32.totalorder %s1791_s20, 2 }
   0x9   : > { %s30_s21 = ssub.s32 %s1153_s16, %s1789_s19  ;;  %p914_p6 = scmp.ge.s32.totalorder %s1161_s18, 4 }
   0xa   : > { %s1793_s20 = smov (%p27_p4, %s1791_s20), 0 }
   0xb   : > { %s29_s22 = ssub.s32 %s1157_s17, %s1793_s20  ;;  %143 = sbr.rel (%p914_p6) target bundleno = 55 (0x37), region = 20 }
   0xc   : > { %s31_s23 = sor.u32 %s30_s21, %s29_s22 }
   0xd   : > { %p32_p5 = scmp.eq.s32.totalorder %s31_s23, 0 }
   0xf   : > { %s1242_s25 = scalar_select %p32_p5, %s1141_s13, %s34_s24  }
  0x10   : > { %146 = sbr.rel (!%p43_p3) target bundleno = 55 (0x37), region = 24  ;;  %s148_s26 = sand.u32 (%p43_p3), 1, %s1141_s13  }
  0x11   : > { %s917_s27 = sshll.u32 (%p43_p3), %s1153_s16, 4  ;;  %s915_s28 = sshll.u32 (%p43_p3), %s148_s26, 8 }
  0x12   : > { %s928_s29 = sshll.u32 (%p43_p3), %s1157_s17, 6  ;;  %s1256_s8 = scalar_lea.vmem (%p43_p3), [#allocation4], %s915_s28 }
  0x13   : > { %s154_s30 = sadd.s32 (%p43_p3), %s928_s29, %s917_s27 }
  0x14   : > { %s919_s4 = sshll.u32 (%p43_p3), %s154_s30, 3 }
  0x15   : > { %s1251_s7 = scalar_lea.vmem %s1773_s0, %s919_s4 }
  0x16   : > { %v169_v0 = vld [vmem:[%s1251_s7] sm:$0xff]  ;;  %v171_v1 = vld [vmem:[%s1251_s7 + $0x8] sm:$0xff]  ;;  %v173_v2 = vld [vmem:[%s1251_s7 + $0x10] sm:$0xff] }
  0x17   : > { %170 = vst [vmem:[%s1256_s8] sm:$0xff] %v169_v0  ;;  %v175_v3 = vld [vmem:[%s1251_s7 + $0x18] sm:$0xff]  ;;  %v177_v4 = vld [vmem:[%s1251_s7 + $0x20] sm:$0xff]  ;;  %v179_v5 = vld [vmem:[%s1251_s7 + $0x28] sm:$0xff] }
  0x18   : > { %172 = vst [vmem:[%s1256_s8 + $0x8] sm:$0xff] %v171_v1  ;;  %v181_v6 = vld [vmem:[%s1251_s7 + $0x30] sm:$0xff]  ;;  %v183_v7 = vld [vmem:[%s1251_s7 + $0x38] sm:$0xff]  ;;  %v185_v8 = vld [vmem:[%s1251_s7 + $0x40] sm:$0xff] }
  0x19   : > { %174 = vst [vmem:[%s1256_s8 + $0x10] sm:$0xff] %v173_v2  ;;  %v187_v9 = vld [vmem:[%s1251_s7 + $0x48] sm:$0xff]  ;;  %v189_v10 = vld [vmem:[%s1251_s7 + $0x50] sm:$0xff]  ;;  %v191_v11 = vld [vmem:[%s1251_s7 + $0x58] sm:$0xff] }
  0x1a   : > { %176 = vst [vmem:[%s1256_s8 + $0x18] sm:$0xff] %v175_v3  ;;  %v193_v12 = vld [vmem:[%s1251_s7 + $0x60] sm:$0xff]  ;;  %v195_v13 = vld [vmem:[%s1251_s7 + $0x68] sm:$0xff]  ;;  %v197_v14 = vld [vmem:[%s1251_s7 + $0x70] sm:$0xff] }
  0x1b   : > { %178 = vst [vmem:[%s1256_s8 + $0x20] sm:$0xff] %v177_v4  ;;  %v199_v15 = vld [vmem:[%s1251_s7 + $0x78] sm:$0xff]  ;;  %v201_v16 = vld [vmem:[%s1251_s7 + $0x100] sm:$0xff]  ;;  %v203_v17 = vld [vmem:[%s1251_s7 + $0x108] sm:$0xff] }
  0x1c   : > { %180 = vst [vmem:[%s1256_s8 + $0x28] sm:$0xff] %v179_v5  ;;  %v205_v18 = vld [vmem:[%s1251_s7 + $0x110] sm:$0xff]  ;;  %v207_v19 = vld [vmem:[%s1251_s7 + $0x118] sm:$0xff]  ;;  %v209_v20 = vld [vmem:[%s1251_s7 + $0x120] sm:$0xff] }
  0x1d   : > { %182 = vst [vmem:[%s1256_s8 + $0x30] sm:$0xff] %v181_v6  ;;  %v211_v21 = vld [vmem:[%s1251_s7 + $0x128] sm:$0xff]  ;;  %v213_v22 = vld [vmem:[%s1251_s7 + $0x130] sm:$0xff]  ;;  %v215_v23 = vld [vmem:[%s1251_s7 + $0x138] sm:$0xff] }
  0x1e   : > { %184 = vst [vmem:[%s1256_s8 + $0x38] sm:$0xff] %v183_v7  ;;  %v217_v24 = vld [vmem:[%s1251_s7 + $0x140] sm:$0xff]  ;;  %v219_v25 = vld [vmem:[%s1251_s7 + $0x148] sm:$0xff]  ;;  %v221_v26 = vld [vmem:[%s1251_s7 + $0x150] sm:$0xff] }
  0x1f   : > { %186 = vst [vmem:[%s1256_s8 + $0x40] sm:$0xff] %v185_v8  ;;  %v223_v27 = vld [vmem:[%s1251_s7 + $0x158] sm:$0xff]  ;;  %v225_v28 = vld [vmem:[%s1251_s7 + $0x160] sm:$0xff]  ;;  %v227_v29 = vld [vmem:[%s1251_s7 + $0x168] sm:$0xff] }
  0x20   : > { %188 = vst [vmem:[%s1256_s8 + $0x48] sm:$0xff] %v187_v9  ;;  %v229_v30 = vld [vmem:[%s1251_s7 + $0x170] sm:$0xff]  ;;  %v231_v31 = vld [vmem:[%s1251_s7 + $0x178] sm:$0xff] }
  0x21   : > { %190 = vst [vmem:[%s1256_s8 + $0x50] sm:$0xff] %v189_v10 }
  0x22   : > { %192 = vst [vmem:[%s1256_s8 + $0x58] sm:$0xff] %v191_v11 }
  0x23   : > { %194 = vst [vmem:[%s1256_s8 + $0x60] sm:$0xff] %v193_v12 }
  0x24   : > { %196 = vst [vmem:[%s1256_s8 + $0x68] sm:$0xff] %v195_v13 }
  0x25   : > { %198 = vst [vmem:[%s1256_s8 + $0x70] sm:$0xff] %v197_v14 }
  0x26   : > { %200 = vst [vmem:[%s1256_s8 + $0x78] sm:$0xff] %v199_v15 }
  0x27   : > { %202 = vst [vmem:[%s1256_s8 + $0x80] sm:$0xff] %v201_v16 }
  0x28   : > { %204 = vst [vmem:[%s1256_s8 + $0x88] sm:$0xff] %v203_v17 }
  0x29   : > { %206 = vst [vmem:[%s1256_s8 + $0x90] sm:$0xff] %v205_v18 }
  0x2a   : > { %208 = vst [vmem:[%s1256_s8 + $0x98] sm:$0xff] %v207_v19 }
  0x2b   : > { %210 = vst [vmem:[%s1256_s8 + $0xa0] sm:$0xff] %v209_v20 }
  0x2c   : > { %212 = vst [vmem:[%s1256_s8 + $0xa8] sm:$0xff] %v211_v21 }
  0x2d   : > { %214 = vst [vmem:[%s1256_s8 + $0xb0] sm:$0xff] %v213_v22 }
  0x2e   : > { %216 = vst [vmem:[%s1256_s8 + $0xb8] sm:$0xff] %v215_v23 }
  0x2f   : > { %218 = vst [vmem:[%s1256_s8 + $0xc0] sm:$0xff] %v217_v24 }
  0x30   : > { %220 = vst [vmem:[%s1256_s8 + $0xc8] sm:$0xff] %v219_v25 }
  0x31   : > { %222 = vst [vmem:[%s1256_s8 + $0xd0] sm:$0xff] %v221_v26 }
  0x32   : > { %224 = vst [vmem:[%s1256_s8 + $0xd8] sm:$0xff] %v223_v27 }
  0x33   : > { %226 = vst [vmem:[%s1256_s8 + $0xe0] sm:$0xff] %v225_v28 }
  0x34   : > { %228 = vst [vmem:[%s1256_s8 + $0xe8] sm:$0xff] %v227_v29 }
  0x35   : > { %230 = vst [vmem:[%s1256_s8 + $0xf0] sm:$0xff] %v229_v30 }
  0x36   : > { %232 = vst [vmem:[%s1256_s8 + $0xf8] sm:$0xff] %v231_v31 }
  0x37 PF: > { %p920_p7 = scmp.ge.s32.totalorder %s1161_s18, 1  ;;  %p246_p8 = scmp.lt.s32.totalorder %s1161_s18, 5 }
  0x39   : > { %p247_p9 = pnand %p920_p7, %p246_p8 }
  0x3a   : > { %s253_s9 = sand.u32 (!%p247_p9), 1, %s1137_s12   ;;  %s922_s10 = sshll.u32 (!%p247_p9), %s1149_s15, 1 }
  0x3b   : > { %250 = sbr.rel (%p247_p9) target bundleno = 857 (0x359), region = 51  ;;  %s921_s11 = sshll.u32 (!%p247_p9), %s253_s9, 8 }
  0x3c   : > { %p282_p10 = scmp.lt.s32.totalorder (!%p247_p9), %s922_s10, 3  ;;  %p287_p11 = scmp.lt.s32.totalorder (!%p247_p9), %s1149_s15, 1 }
  0x3d   : > { %s1335_s30 = scalar_lea.vmem (!%p247_p9), [#allocation4], %s921_s11  ;;  %p924_p12 = scmp.ne.s32.totalorder (!%p247_p9), %s1145_s14, 0 }
  0x40   : > { %s1795_s10 = smov (!%p282_p10, %s922_s10), 3  ;;  %293 = sbr.rel (%p924_p12) target bundleno = 74 (0x4a), region = 59 }
  0x41   : > { %s288_s21 = scalar_select %p287_p11, %s1149_s15, 1 }
  0x42   : > { %s923_s22 = sshll.u32 %s1795_s10, 3 }
  0x43   : > { %s1328_s26 = scalar_lea.vmem %s1774_s1, %s923_s22  ;;  %s1333_s29 = scalar_lea.vmem %s1776_s3, %s288_s21 }
  0x45   : > { %vm294_vm0 = vcmask 7168   ;;  %v1163_v32 = vmov -inf   ;;  %v1164_v33 = vmov 0.0  }
  0x46   : > { %295 = vst.msk [vmem:[#allocation2] sm:$0xff] %vm294_vm0, %v1163_v32 }
  0x47   : > { %296 = vst.msk [vmem:[#allocation2 + $0x8] sm:$0xff] %vm294_vm0, %v1163_v32 }
  0x48   : > { %297 = vst.msk [vmem:[#allocation3] sm:$0xff] %vm294_vm0, %v1164_v33 }
  0x49   : > { %298 = vst.msk [vmem:[#allocation3 + $0x8] sm:$0xff] %vm294_vm0, %v1164_v33 }
  0x4a PF: > { %v1339_v34 = vld [vmem:[%s1335_s30] sm:$0xff]  ;;  %v1342_v35 = vld [vmem:[%s1335_s30 + $0x8] sm:$0xff]  ;;  %v1345_v36 = vld [vmem:[%s1335_s30 + $0x10] sm:$0xff]  ;;  %v1165_v32 = vmov 0   ;;  %vm521_vm1 = vcmask 7168   ;;  %p526_p13 = scmp.eq.s32.totalorder %s1145_s14, 1 }
  0x4b   : > { %v1348_v37 = vld [vmem:[%s1335_s30 + $0x18] sm:$0xff]  ;;  %v1351_v38 = vld [vmem:[%s1335_s30 + $0x20] sm:$0xff]  ;;  %v1354_v39 = vld [vmem:[%s1335_s30 + $0x28] sm:$0xff]  ;;  %v333_v40 = vmax.f32 %v1339_v34, %v1345_v36  ;;  %993 = vset.pattern.permute.xlu1 %v1165_v32  ;;  %994 = vset.pattern.permute.xlu0 %v1165_v32  ;;  %p925_p0 = scmp.ne.s32.totalorder %s1145_s14, 1 }
  0x4c   : > { %v1359_v41 = vld [vmem:[%s1335_s30 + $0x30] sm:$0xff]  ;;  %v334_v42 = vmax.f32 %v1342_v35, %v1348_v37  ;;  %v1364_v43 = vld [vmem:[%s1335_s30 + $0x38] sm:$0xff]  ;;  %v1368_v45 = vld [vmem:[%s1335_s30 + $0x40] sm:$0xff]  ;;  %s1166_s12 = smov (!%p925_p0), 127   ;;  %s1167_s4 = smov (!%p925_p0), 1  }
  0x4d   : > { %v335_v44 = vmax.f32 %v333_v40, %v1351_v38  ;;  %v1371_v46 = vld [vmem:[%s1335_s30 + $0x48] sm:$0xff]  ;;  %v1375_v48 = vld [vmem:[%s1335_s30 + $0x50] sm:$0xff]  ;;  %v1379_v50 = vld [vmem:[%s1335_s30 + $0x80] sm:$0xff] }
  0x4e   : > { %v336_v47 = vmax.f32 %v334_v42, %v1354_v39  ;;  %v1382_v51 = vld [vmem:[%s1335_s30 + $0x88] sm:$0xff]  ;;  %v1386_v53 = vld [vmem:[%s1335_s30 + $0x90] sm:$0xff]  ;;  %v1389_v54 = vld [vmem:[%s1335_s30 + $0x98] sm:$0xff] }
  0x4f   : > { %v337_v49 = vmax.f32 %v335_v44, %v1359_v41  ;;  %v1392_v55 = vld [vmem:[%s1335_s30 + $0xa0] sm:$0xff]  ;;  %v1395_v56 = vld [vmem:[%s1335_s30 + $0x58] sm:$0xff]  ;;  %v1399_v58 = vld [vmem:[%s1335_s30 + $0xa8] sm:$0xff]  ;;  %v350_v59 = vmax.f32 %v1379_v50, %v1386_v53  ;;  %v351_v60 = vmax.f32 %v1382_v51, %v1389_v54 }
  0x50   : > { %v338_v52 = vmax.f32 %v336_v47, %v1364_v43  ;;  %v1406_v61 = vld [vmem:[%s1335_s30 + $0x60] sm:$0xff]  ;;  %v1410_v63 = vld [vmem:[%s1335_s30 + $0xb0] sm:$0xff]  ;;  %v1413_v0 = vld [vmem:[%s1335_s30 + $0xb8] sm:$0xff] }
  0x51   : > { %v339_v57 = vmax.f32 %v337_v49, %v1368_v45  ;;  %v1416_v1 = vld [vmem:[%s1335_s30 + $0x68] sm:$0xff]  ;;  %v352_v3 = vmax.f32 %v350_v59, %v1392_v55  ;;  %v353_v4 = vmax.f32 %v351_v60, %v1399_v58  ;;  %v1422_v5 = vld [vmem:[%s1335_s30 + $0x70] sm:$0xff]  ;;  %v1426_v7 = vld [vmem:[%s1335_s30 + $0xc0] sm:$0xff] }
  0x52   : > { %v340_v62 = vmax.f32 %v338_v52, %v1371_v46  ;;  %v1429_v8 = vld [vmem:[%s1335_s30 + $0xc8] sm:$0xff]  ;;  %v1432_v9 = vld [vmem:[%s1335_s30 + $0x78] sm:$0xff]  ;;  %v1439_v14 = vld [vmem:[%s1335_s30 + $0xd0] sm:$0xff] }
  0x53   : > { %v341_v2 = vmax.f32 %v339_v57, %v1375_v48  ;;  %v354_v11 = vmax.f32 %v352_v3, %v1410_v63  ;;  %v355_v12 = vmax.f32 %v353_v4, %v1413_v0  ;;  %v1442_v15 = vld [vmem:[%s1335_s30 + $0xd8] sm:$0xff]  ;;  %v1449_v20 = vld [vmem:[%s1335_s30 + $0xe0] sm:$0xff]  ;;  %v1452_v21 = vld [vmem:[%s1335_s30 + $0xe8] sm:$0xff] }
  0x54   : > { %v342_v6 = vmax.f32 %v340_v62, %v1395_v56  ;;  %v1457_v25 = vld [vmem:[%s1335_s30 + $0xf0] sm:$0xff]  ;;  %v1460_v26 = vld [vmem:[%s1335_s30 + $0xf8] sm:$0xff]  ;;  %v1466_v33 = vld [vmem:[#allocation2] sm:$0xff] }
  0x55   : > { %v343_v10 = vmax.f32 %v341_v2, %v1406_v61  ;;  %v356_v17 = vmax.f32 %v354_v11, %v1426_v7  ;;  %v357_v18 = vmax.f32 %v355_v12, %v1429_v8  ;;  %v1476_v47 = vld [vmem:[#allocation2 + $0x8] sm:$0xff] }
  0x56   : > { %v344_v13 = vmax.f32 %v342_v6, %v1416_v1 }
  0x57   : > { %v345_v16 = vmax.f32 %v343_v10, %v1422_v5  ;;  %v358_v22 = vmax.f32 %v356_v17, %v1439_v14  ;;  %v359_v23 = vmax.f32 %v357_v18, %v1442_v15 }
  0x58   : > { %v346_v19 = vmax.f32 %v344_v13, %v1432_v9 }
  0x59   : > { %v360_v27 = vmax.f32 %v358_v22, %v1449_v20  ;;  %v361_v28 = vmax.f32 %v359_v23, %v1452_v21 }
  0x5a   : > { %v347_v24 = vmax.f32 %v345_v16, %v346_v19 }
  0x5b   : > { %v362_v29 = vmax.f32 %v360_v27, %v1457_v25  ;;  %v363_v30 = vmax.f32 %v361_v28, %v1460_v26 }
  0x5c   : > { %348 = vmax.xlane.f32.xlu0 %v347_v24 }
  0x5d   : > { %v364_v31 = vmax.f32 %v362_v29, %v363_v30 }
  0x64   : > { %365 = vmax.xlane.f32.xlu0 %v364_v31 }
  0xcf   : > { %v349_v40 = vpop.xlane.xlu0 %348 }
  0xd0   : > { %v1469_v42 = vmax.f32 %v1466_v33, %v349_v40 }
  0xd2   : > { %v371_v44 = vsub.f32 %v1466_v33, %v1469_v42  ;;  %524 = vst.msk [vmem:[#allocation2] sm:$0xff] %vm521_vm1, %v1469_v42  ;;  %381 = vperm.xlu1 %993, %v1469_v42  }
  0xd7   : > { %v366_v49 = vpop.xlane.xlu0 %365 }
  0xd8   : > { %v1479_v52 = vmax.f32 %v1476_v47, %v366_v49 }
  0xda   : > { %v372_v57 = vsub.f32 %v1476_v47, %v1479_v52  ;;  %525 = vst.msk [vmem:[#allocation2 + $0x8] sm:$0xff] %vm521_vm1, %v1479_v52  ;;  %386 = vperm.xlu1 %993, %v1479_v52  }
 0x144   : > { %v1486_v59 = vpop.permute.xlu1 %381 }
 0x145   : > { %v389_v60 = vsub.f32 %v1339_v34, %v1486_v59  ;;  %v390_v62 = vsub.f32 %v1342_v35, %v1486_v59  ;;  %v391_v2 = vsub.f32 %v1345_v36, %v1486_v59  ;;  %v392_v3 = vsub.f32 %v1348_v37, %v1486_v59 }
 0x146   : > { %v393_v10 = vsub.f32 %v1351_v38, %v1486_v59  ;;  %v394_v12 = vsub.f32 %v1354_v39, %v1486_v59  ;;  %v395_v35 = vsub.f32 %v1359_v41, %v1486_v59  ;;  %v396_v37 = vsub.f32 %v1364_v43, %v1486_v59 }
 0x147   : > { %v421_v4 = vmul.f32 1.442695, %v389_v60  ;;  %v423_v6 = vmul.f32 1.442695, %v390_v62  ;;  %v425_v11 = vmul.f32 1.442695, %v391_v2  ;;  %v397_v17 = vsub.f32 %v1368_v45, %v1486_v59 }
 0x148   : > { %v427_v34 = vmul.f32 1.442695, %v392_v3  ;;  %v429_v36 = vmul.f32 1.442695, %v393_v10  ;;  %v431_v16 = vmul.f32 1.442695, %v394_v12  ;;  %v398_v39 = vsub.f32 %v1371_v46, %v1486_v59 }
 0x149   : > { %995 = vpow2.f32 %v421_v4  ;;  %v433_v19 = vmul.f32 1.442695, %v395_v35  ;;  %v435_v24 = vmul.f32 1.442695, %v396_v37  ;;  %v399_v27 = vsub.f32 %v1375_v48, %v1486_v59 }
 0x14a   : > { %997 = vpow2.f32 %v423_v6  ;;  %v437_v45 = vmul.f32 1.442695, %v397_v17  ;;  %v439_v46 = vmul.f32 1.442695, %v398_v39  ;;  %v401_v48 = vsub.f32 %v1406_v61, %v1486_v59 }
 0x14b   : > { %999 = vpow2.f32 %v425_v11  ;;  %v441_v60 = vmul.f32 1.442695, %v399_v27  ;;  %v402_v3 = vsub.f32 %v1416_v1, %v1486_v59  ;;  %v403_v11 = vsub.f32 %v1422_v5, %v1486_v59 }
 0x14c   : > { %v1502_v13 = vpop.permute.xlu1 %386  ;;  %1001 = vpow2.f32 %v427_v34  ;;  %v445_v12 = vmul.f32 1.442695, %v401_v48  ;;  %v404_v37 = vsub.f32 %v1432_v9, %v1486_v59 }
 0x14d   : > { %1003 = vpow2.f32 %v429_v36  ;;  %v405_v22 = vsub.f32 %v1379_v50, %v1502_v13  ;;  %v406_v43 = vsub.f32 %v1382_v51, %v1502_v13  ;;  %v407_v30 = vsub.f32 %v1386_v53, %v1502_v13 }
 0x14e   : > { %1005 = vpow2.f32 %v431_v16  ;;  %v400_v50 = vsub.f32 %v1395_v56, %v1486_v59  ;;  %v408_v51 = vsub.f32 %v1389_v54, %v1502_v13  ;;  %v409_v53 = vsub.f32 %v1392_v55, %v1502_v13 }
 0x14f   : > { %v996_v38 = vpop.eup %995  ;;  %1007 = vpow2.f32 %v433_v19  ;;  %v453_v32 = vmul.f32 1.442695, %v405_v22  ;;  %v455_v49 = vmul.f32 1.442695, %v406_v43  ;;  %v457_v56 = vmul.f32 1.442695, %v407_v30 }
 0x150   : > { %v998_v18 = vpop.eup %997  ;;  %1009 = vpow2.f32 %v435_v24  ;;  %v443_v4 = vmul.f32 1.442695, %v400_v50  ;;  %v410_v10 = vsub.f32 %v1399_v58, %v1502_v13  ;;  %v459_v61 = vmul.f32 1.442695, %v408_v51 }
 0x151   : > { %v485_v41 = vadd.f32 %v998_v18, %v996_v38  ;;  %v1000_v23 = vpop.eup %999  ;;  %1011 = vpow2.f32 %v437_v45  ;;  %v411_v35 = vsub.f32 %v1410_v63, %v1502_v13  ;;  %v461_v1 = vmul.f32 1.442695, %v409_v53 }
 0x152   : > { %v1002_v29 = vpop.eup %1001  ;;  %1013 = vpow2.f32 %v439_v46  ;;  %v447_v58 = vmul.f32 1.442695, %v402_v3  ;;  %v412_v5 = vsub.f32 %v1413_v0, %v1502_v13  ;;  %v463_v17 = vmul.f32 1.442695, %v410_v10 }
 0x153   : > { %v486_v28 = vadd.f32 %v1000_v23, %v485_v41  ;;  %v1004_v40 = vpop.eup %1003  ;;  %1015 = vpow2.f32 %v453_v32  ;;  %v449_v39 = vmul.f32 1.442695, %v403_v11  ;;  %v413_v41 = vsub.f32 %v1426_v7, %v1502_v13 }
 0x154   : > { %v1006_v2 = vpop.eup %1005  ;;  %1017 = vpow2.f32 %v455_v49  ;;  %v465_v22 = vmul.f32 1.442695, %v411_v35  ;;  %v451_v59 = vmul.f32 1.442695, %v404_v37  ;;  %v414_v0 = vsub.f32 %v1429_v8, %v1502_v13 }
 0x155   : > { %v487_v31 = vadd.f32 %v1002_v29, %v486_v28  ;;  %v1008_v54 = vpop.eup %1007  ;;  %1019 = vpow2.f32 %v441_v60  ;;  %v467_v27 = vmul.f32 1.442695, %v412_v5  ;;  %v415_v7 = vsub.f32 %v1439_v14, %v1502_v13 }
 0x156   : > { %v1010_v55 = vpop.eup %1009  ;;  %1021 = vpow2.f32 %v457_v56  ;;  %v469_v30 = vmul.f32 1.442695, %v413_v41  ;;  %v416_v8 = vsub.f32 %v1442_v15, %v1502_v13  ;;  %v471_v51 = vmul.f32 1.442695, %v414_v0 }
 0x157   : > { %v488_v62 = vadd.f32 %v1004_v40, %v487_v31  ;;  %v1012_v36 = vpop.eup %1011  ;;  %1023 = vpow2.f32 %v443_v4  ;;  %v473_v14 = vmul.f32 1.442695, %v415_v7 }
 0x158   : > { %v1014_v38 = vpop.eup %1013  ;;  %1025 = vpow2.f32 %v459_v61  ;;  %v475_v15 = vmul.f32 1.442695, %v416_v8 }
 0x159   : > { %v489_v6 = vadd.f32 %v1006_v2, %v488_v62  ;;  %v1016_v18 = vpop.eup %1015  ;;  %1027 = vpow2.f32 %v445_v12  ;;  %v417_v2 = vsub.f32 %v1449_v20, %v1502_v13  ;;  %v419_v12 = vsub.f32 %v1457_v25, %v1502_v13 }
 0x15a   : > { %v1018_v63 = vpop.eup %1017  ;;  %1029 = vpow2.f32 %v461_v1  ;;  %v420_v1 = vsub.f32 %v1460_v26, %v1502_v13 }
 0x15b   : > { %v490_v34 = vadd.f32 %v1008_v54, %v489_v6  ;;  %v1020_v9 = vpop.eup %1019  ;;  %1031 = vpow2.f32 %v447_v58  ;;  %v502_v24 = vadd.f32 %v1018_v63, %v1016_v18  ;;  %v418_v6 = vsub.f32 %v1452_v21, %v1502_v13 }
 0x15c   : > { %v1022_v43 = vpop.eup %1021  ;;  %1033 = vpow2.f32 %v463_v17  ;;  %v477_v20 = vmul.f32 1.442695, %v417_v2  ;;  %v481_v58 = vmul.f32 1.442695, %v419_v12  ;;  %v483_v25 = vmul.f32 1.442695, %v420_v1 }
 0x15d   : > { %v491_v16 = vadd.f32 %v1010_v55, %v490_v34  ;;  %v1024_v45 = vpop.eup %1023  ;;  %1035 = vpow2.f32 %v449_v39  ;;  %v503_v29 = vadd.f32 %v1022_v43, %v502_v24  ;;  %v479_v21 = vmul.f32 1.442695, %v418_v6  ;;  %v369_v24 = vld [vmem:[#allocation3] sm:$0xff] }
 0x15e   : > { %v1026_v46 = vpop.eup %1025  ;;  %1037 = vpow2.f32 %v465_v22 }
 0x15f   : > { %v492_v19 = vadd.f32 %v1012_v36, %v491_v16  ;;  %v1028_v50 = vpop.eup %1027  ;;  %1039 = vpow2.f32 %v451_v59  ;;  %v504_v32 = vadd.f32 %v1026_v46, %v503_v29  ;;  %v373_v59 = vmul.f32 1.442695, %v371_v44  ;;  %v370_v29 = vld [vmem:[#allocation3 + $0x8] sm:$0xff] }
 0x160   : > { %v1030_v40 = vpop.eup %1029  ;;  %1041 = vpow2.f32 %v467_v27 }
 0x161   : > { %v493_v23 = vadd.f32 %v1014_v38, %v492_v19  ;;  %v1032_v49 = vpop.eup %1031  ;;  %v505_v60 = vadd.f32 %v1030_v40, %v504_v32  ;;  %1043 = vpow2.f32 %v469_v30 }
 0x162   : > { %v1034_v62 = vpop.eup %1033  ;;  %1045 = vpow2.f32 %v471_v51 }
 0x163   : > { %v494_v28 = vadd.f32 %v1020_v9, %v493_v23  ;;  %v1036_v53 = vpop.eup %1035  ;;  %v506_v3 = vadd.f32 %v1034_v62, %v505_v60  ;;  %1047 = vpow2.f32 %v473_v14 }
 0x164   : > { %v1038_v4 = vpop.eup %1037  ;;  %1049 = vpow2.f32 %v475_v15 }
 0x165   : > { %v495_v31 = vadd.f32 %v1024_v45, %v494_v28  ;;  %v1040_v54 = vpop.eup %1039  ;;  %v507_v61 = vadd.f32 %v1038_v4, %v506_v3  ;;  %1051 = vpow2.f32 %v477_v20  ;;  %v375_v45 = vmul.f32 1.442695, %v372_v57 }
 0x166   : > { %v1042_v11 = vpop.eup %1041  ;;  %1053 = vpow2.f32 %v479_v21 }
 0x167   : > { %v496_v48 = vadd.f32 %v1028_v50, %v495_v31  ;;  %v508_v55 = vadd.f32 %v1042_v11, %v507_v61  ;;  %v1044_v35 = vpop.eup %1043  ;;  %1055 = vpow2.f32 %v481_v58 }
 0x168   : > { %v1046_v37 = vpop.eup %1045  ;;  %1057 = vpow2.f32 %v483_v25 }
 0x169   : > { %v497_v56 = vadd.f32 %v1032_v49, %v496_v48  ;;  %v509_v36 = vadd.f32 %v1044_v35, %v508_v55  ;;  %v1048_v38 = vpop.eup %1047  ;;  %1059 = vpow2.f32 %v373_v59 }
 0x16a   : > { %v1050_v17 = vpop.eup %1049  ;;  %1061 = vpow2.f32 %v375_v45 }
 0x16b   : > { %v498_v10 = vadd.f32 %v1036_v53, %v497_v56  ;;  %v510_v16 = vadd.f32 %v1046_v37, %v509_v36  ;;  %v1052_v39 = vpop.eup %1051 }
 0x16c   : > { %v1054_v13 = vpop.eup %1053 }
 0x16d   : > { %v499_v34 = vadd.f32 %v1040_v54, %v498_v10  ;;  %v511_v5 = vadd.f32 %v1048_v38, %v510_v16  ;;  %v1056_v63 = vpop.eup %1055 }
 0x16e   : > { %v1058_v22 = vpop.eup %1057 }
 0x16f   : > { %500 = vadd.xlane.f32.xlu2 %v499_v34  ;;  %v512_v18 = vadd.f32 %v1050_v17, %v511_v5  ;;  %v1060_v23 = vpop.eup %1059 }
 0x170   : > { %v377_v43 = vmul.f32 %v1060_v23, %v369_v24  ;;  %v1062_v28 = vpop.eup %1061 }
 0x171   : > { %v513_v26 = vadd.f32 %v1052_v39, %v512_v18  ;;  %v378_v46 = vmul.f32 %v1062_v28, %v370_v29 }
 0x173   : > { %v514_v19 = vadd.f32 %v1054_v13, %v513_v26 }
 0x175   : > { %v515_v41 = vadd.f32 %v1056_v63, %v514_v19 }
 0x177   : > { %v516_v9 = vadd.f32 %v1058_v22, %v515_v41 }
 0x179   : > { %517 = vadd.xlane.f32.xlu2 %v516_v9 }
 0x1e2   : > { %v501_v0 = vpop.xlane.xlu2 %500 }
 0x1e3   : > { %v519_v27 = vadd.f32 %v501_v0, %v377_v43 }
 0x1e5   : > { %522 = vst.msk [vmem:[#allocation3] sm:$0xff] %vm521_vm1, %v519_v27 }
 0x1eb   : > { %529 = sbr.rel (%p925_p0) target bundleno = 756 (0x2f4), region = 63 }
 0x1ec   : > { %v518_v7 = vpop.xlane.xlu2 %517 }
 0x1ed   : > { %v520_v30 = vadd.f32 %v518_v7, %v378_v46 }
 0x1ef   : > { %523 = vst.msk [vmem:[#allocation3 + $0x8] sm:$0xff] %vm521_vm1, %v520_v30 }
 0x1f0   : > { %v1565_v33 = vld [vmem:[%s1328_s26] sm:$0xff]  ;;  %v536_v42 = vld [vmem:[#allocation3] sm:$0xff]  ;;  %v1569_v47 = vld [vmem:[%s1328_s26 + $0x8] sm:$0xff]  ;;  %v1168_v20 = vmov 2   ;;  %v1169_v21 = vmov 1   ;;  %vm619_vm10 = vcmask 23568  }
 0x1f1   : > { %611 = vrot.lane.b32.xlu1 %v1565_v33, %s1166_s12  ;;  %1065 = vlog2.f32 %v536_v42  ;;  %v534_v57 = vld [vmem:[#allocation2] sm:$0xff]  ;;  %v535_v40 = vld [vmem:[#allocation2 + $0x8] sm:$0xff]  ;;  %v532_v60 = vmax.f32 %v1565_v33, 1e-06  ;;  %v533_v62 = vmax.f32 %v1569_v47, 1e-06  ;;  %1064 = vset.pattern.permute.xlu0 %v1168_v20 }
 0x1f2   : > { %1063 = vset.pattern.permute.xlu2 %v1169_v21  ;;  %vm556_vm11 = vcmask 15368  }
 0x1f3   : > { %vm582_vm2 = vweird.f32 %v532_v60  ;;  %v588_v10 = vand.u32 2147483648, %v532_v60  ;;  %v586_v61 = vand.u32 2147483647, %v532_v60  ;;  %vm597_vm4 = vweird.f32 %v533_v62 }
 0x1f4   : > { %v603_v12 = vand.u32 2147483648, %v533_v62  ;;  %v601_v55 = vand.u32 2147483647, %v533_v62  ;;  %v575_v37 = vmul.f32 8.264463e-05, %v532_v60  ;;  %v566_v23 = vsel %vm556_vm11, %v1565_v33, 0.0 }
 0x1f5   : > { %v589_v35 = vor.u32 1.1754944e-38, %v588_v10  ;;  %vm587_vm8 = vcmp.eq.f32.partialorder %v586_v61, 8.507059e+37  ;;  %v576_v25 = vmul.f32 8.264463e-05, %v533_v62  ;;  %v567_v24 = vsel %vm556_vm11, %v1569_v47, 0.0 }
 0x1f6   : > { %v537_v44 = vld [vmem:[#allocation3 + $0x8] sm:$0xff]  ;;  %v604_v36 = vor.u32 1.1754944e-38, %v603_v12  ;;  %vm602_vm9 = vcmp.eq.f32.partialorder %v601_v55, 8.507059e+37  ;;  %v568_v27 = vadd.f32 %v567_v24, %v566_v23 }
 0x1f7   : > { %1067 = vlog2.f32 %v537_v44  ;;  %v1066_v52 = vpop.eup %1065 }
 0x1f8   : > { %v539_v50 = vmul.f32 0.6931472, %v1066_v52  ;;  %1069 = vrcp.f32 %v532_v60  ;;  %v569_v30 = vrot.slane %v568_v27, 4 }
 0x1f9   : > { %613 = vrot.lane.b32.xlu1 %v1569_v47, %s1166_s12  ;;  %1071 = vrcp.f32 %v533_v62 }
 0x1fa   : > { %v542_v32 = vadd.f32 %v539_v50, %v534_v57  ;;  %v570_v50 = vadd.f32 %v569_v30, %v568_v27 }
 0x1fc   : > { %v544_v51 = vsub.f32 %v542_v32, %v1565_v33 }
 0x1fd   : > { %v1068_v31 = vpop.eup %1067 }
 0x1fe   : > { %v541_v8 = vmul.f32 0.6931472, %v1068_v31  ;;  %548 = vrot.lane.b32.xlu0 %v544_v51, %s1167_s4  ;;  %v1070_v2 = vpop.eup %1069 }
 0x1ff   : > { %v1072_v14 = vpop.eup %1071  ;;  %v578_v53 = vmul.f32 %v1070_v2, %v532_v60  ;;  %vm583_vm3 = vweird.f32 %v1070_v2 }
 0x200   : > { %v543_v49 = vadd.f32 %v541_v8, %v535_v40  ;;  %v593_v56 = vmul.f32 %v1072_v14, %v533_v62  ;;  %vm598_vm5 = vweird.f32 %v1072_v14  ;;  %vm1576_vm6 = vmor %vm582_vm2, %vm583_vm3  ;;  %v571_v40 = vrot.slane %v570_v50, 2 }
 0x201   : > { %v579_v3 = vsub.f32 1.0, %v578_v53  ;;  %vm599_vm7 = vmor %vm597_vm4, %vm598_vm5 }
 0x202   : > { %v545_v48 = vsub.f32 %v543_v49, %v1569_v47  ;;  %v594_v4 = vsub.f32 1.0, %v593_v56  ;;  %v572_v49 = vadd.f32 %v571_v40, %v570_v50 }
 0x203   : > { %v580_v6 = vmul.f32 %v1070_v2, %v579_v3 }
 0x204   : > { %v595_v15 = vmul.f32 %v1072_v14, %v594_v4 }
 0x205   : > { %v581_v54 = vadd.f32 %v1070_v2, %v580_v6 }
 0x206   : > { %550 = vrot.lane.b32.xlu0 %v545_v48, %s1167_s4  ;;  %v596_v34 = vadd.f32 %v1072_v14, %v595_v15 }
 0x207   : > { %v585_v1 = vsel %vm1576_vm6, %v1070_v2, %v581_v54 }
 0x208   : > { %v600_v58 = vsel %vm599_vm7, %v1072_v14, %v596_v34  ;;  %v590_v38 = vsel %vm587_vm8, %v589_v35, %v585_v1 }
 0x209   : > { %v605_v5 = vsel %vm602_vm9, %v604_v36, %v600_v58  ;;  %v607_v17 = vadd.f32 %v590_v38, %v575_v37 }
 0x20a   : > { %v608_v18 = vadd.f32 %v605_v5, %v576_v25 }
 0x263   : > { %v612_v16 = vpop.permute.xlu1 %611 }
 0x264   : > { %v617_v39 = vmul.f32 %v612_v16, %v607_v17 }
 0x266   : > { %v620_v19 = vsel %vm619_vm10, %v617_v39, 0.0 }
 0x26b   : > { %v614_v26 = vpop.permute.xlu1 %613 }
 0x26c   : > { %v618_v13 = vmul.f32 %v614_v26, %v608_v18 }
 0x26e   : > { %v621_v63 = vsel %vm619_vm10, %v618_v13, 0.0 }
 0x26f   : > { %v622_v41 = vadd.f32 %v621_v63, %v620_v19 }
 0x270   : > { %v549_v9 = vpop.permute.xlu0 %548 }
 0x271   : > { %v623_v22 = vrot.slane %v622_v41, 4  ;;  %v554_v45 = vmul.f32 %v549_v9, %v1565_v33  ;;  %v573_v33 = vrot.slane %v572_v49, 1 }
 0x273   : > { %v624_v59 = vadd.f32 %v623_v22, %v622_v41  ;;  %v557_v42 = vsel %vm556_vm11, %v554_v45, 0.0  ;;  %v574_v60 = vadd.f32 %v573_v33, %v572_v49 }
 0x275   : > { %v625_v43 = vrot.slane %v624_v59, 2 }
 0x277   : > { %v626_v0 = vadd.f32 %v625_v43, %v624_v59 }
 0x278   : > { %v551_v28 = vpop.permute.xlu0 %550 }
 0x279   : > { %v627_v29 = vrot.slane %v626_v0, 1  ;;  %v555_v46 = vmul.f32 %v551_v28, %v1569_v47  ;;  %v629_v47 = vlaneseq }
 0x27b   : > { %v628_v7 = vadd.f32 %v627_v29, %v626_v0  ;;  %v558_v44 = vsel %vm556_vm11, %v555_v46, 0.0  ;;  %v630_v2 = vand.u32 127, %v629_v47 }
 0x27c   : > { %v559_v52 = vadd.f32 %v558_v44, %v557_v42 }
 0x27d   : > { %649 = vperm.xlu0 %1064, %v628_v7   ;;  %vm631_vm12 = vcmp.eq.s32.totalorder %v630_v2, 0  ;;  %vm638_vm13 = vcmp.eq.s32.totalorder %v630_v2, 1  ;;  %vm646_vm14 = vcmp.eq.s32.totalorder %v630_v2, 2 }
 0x27e   : > { %v560_v57 = vrot.slane %v559_v52, 4 }
 0x280   : > { %v561_v31 = vadd.f32 %v560_v57, %v559_v52 }
 0x282   : > { %v562_v32 = vrot.slane %v561_v31, 2 }
 0x284   : > { %v563_v8 = vadd.f32 %v562_v32, %v561_v31 }
 0x286   : > { %v564_v51 = vrot.slane %v563_v8, 1 }
 0x288   : > { %v565_v48 = vadd.f32 %v564_v51, %v563_v8 }
 0x28a   : > { %634 = vperm.xlu2 %1063, %v565_v48  }
 0x292   : > { %641 = vperm.xlu2 %1063, %v574_v60  }
 0x2e4   : > { %v635_v62 = vpop.permute.xlu2 %634 }
 0x2e5   : > { %v637_v53 = vsel %vm631_vm12, %v635_v62, 0.0 }
 0x2ec   : > { %v642_v14 = vpop.permute.xlu2 %641 }
 0x2ed   : > { %v644_v56 = vsel %vm638_vm13, %v642_v14, 0.0 }
 0x2ee   : > { %v645_v3 = vadd.f32 %v644_v56, %v637_v53 }
 0x2ef   : > { %v650_v4 = vpop.permute.xlu0 %649 }
 0x2f0   : > { %v652_v6 = vsel %vm646_vm14, %v650_v4, 0.0 }
 0x2f1   : > { %v653_v15 = vadd.f32 %v652_v6, %v645_v3 }
 0x2f3   : > { %654 = vst [vmem:[%s1333_s29] sm:$0x1] %v653_v15 }
 0x2f4 PF: > { %p655_p1 = scmp.eq.s32.totalorder %s1149_s15, 0 }
 0x2f6   : > { %p656_p2 = pnand %p655_p1, %p526_p13 }
 0x2f8   : > { %659 = sbr.rel (%p656_p2) target bundleno = 857 (0x359), region = 67 }
 0x2fd   : > { %v660_v54 = vld [vmem:[%s1775_s2] sm:$0xff]  ;;  %v663_v10 = vld [vmem:[%s1775_s2 + $0x18] sm:$0xff]  ;;  %v666_v11 = vld [vmem:[%s1775_s2 + $0x30] sm:$0xff] }
 0x2fe   : > { %v676_v61 = vand.u32 2147483647, %v660_v54  ;;  %v677_v12 = vand.u32 2147483647, %v663_v10  ;;  %v669_v20 = vld [vmem:[%s1775_s2 + $0x48] sm:$0xff]  ;;  %v672_v63 = vmin.f32 %v660_v54, 0.0 }
 0x2ff   : > { %v678_v34 = vand.u32 2147483647, %v666_v11  ;;  %v679_v55 = vand.u32 2147483647, %v669_v20  ;;  %v673_v22 = vmin.f32 %v663_v10, 0.0  ;;  %v674_v59 = vmin.f32 %v666_v11, 0.0 }
 0x300   : > { %v680_v35 = vsub.f32 0.0, %v676_v61  ;;  %v681_v1 = vsub.f32 0.0, %v677_v12  ;;  %v675_v43 = vmin.f32 %v669_v20, 0.0  ;;  %v1630_v2 = vld [vmem:[%s1775_s2 + $0x10] sm:$0xff]  ;;  %v1637_v4 = vld [vmem:[%s1775_s2 + $0x28] sm:$0xff]  ;;  %v1643_v10 = vld [vmem:[%s1775_s2 + $0x40] sm:$0xff] }
 0x301   : > { %v682_v21 = vsub.f32 0.0, %v678_v34  ;;  %v683_v36 = vsub.f32 0.0, %v679_v55  ;;  %vm732_vm15 = vcmp.eq.f32.partialorder %v1630_v2, 2.0  ;;  %v1653_v12 = vld [vmem:[%s1775_s2 + $0x58] sm:$0xff]  ;;  %vm728_vm0 = vcmp.eq.f32.partialorder %v1630_v2, 1.0 }
 0x302   : > { %v684_v37 = vmul.f32 1.442695, %v680_v35  ;;  %v686_v58 = vmul.f32 1.442695, %v681_v1  ;;  %vm724_vm2 = vcmp.eq.f32.partialorder %v1630_v2, 0.0  ;;  %vm733_vm3 = vcmp.eq.f32.partialorder %v1637_v4, 2.0 }
 0x303   : > { %v688_v16 = vmul.f32 1.442695, %v682_v21  ;;  %v690_v38 = vmul.f32 1.442695, %v683_v36  ;;  %vm729_vm5 = vcmp.eq.f32.partialorder %v1637_v4, 1.0  ;;  %vm734_vm6 = vcmp.eq.f32.partialorder %v1643_v10, 2.0 }
 0x304   : > { %1073 = vpow2.f32 %v684_v37  ;;  %vm735_vm9 = vcmp.eq.f32.partialorder %v1653_v12, 2.0  ;;  %vm726_vm12 = vcmp.eq.f32.partialorder %v1643_v10, 0.0  ;;  %vm731_vm13 = vcmp.eq.f32.partialorder %v1653_v12, 1.0 }
 0x305   : > { %1075 = vpow2.f32 %v686_v58 }
 0x306   : > { %1077 = vpow2.f32 %v688_v16 }
 0x307   : > { %1079 = vpow2.f32 %v690_v38 }
 0x30a   : > { %v1074_v25 = vpop.eup %1073 }
 0x30b   : > { %v1076_v5 = vpop.eup %1075  ;;  %v692_v17 = vadd.f32 1.0, %v1074_v25 }
 0x30c   : > { %v1078_v18 = vpop.eup %1077  ;;  %v693_v39 = vadd.f32 1.0, %v1076_v5 }
 0x30d   : > { %v1080_v26 = vpop.eup %1079  ;;  %v694_v13 = vadd.f32 1.0, %v1078_v18  ;;  %1081 = vlog2.f32 %v692_v17 }
 0x30e   : > { %v695_v19 = vadd.f32 1.0, %v1080_v26  ;;  %1083 = vlog2.f32 %v693_v39 }
 0x30f   : > { %1085 = vlog2.f32 %v694_v13 }
 0x310   : > { %1087 = vlog2.f32 %v695_v19  ;;  %v661_v19 = vld [vmem:[%s1775_s2 + $0x8] sm:$0xff] }
 0x313   : > { %v1082_v41 = vpop.eup %1081 }
 0x314   : > { %v1084_v9 = vpop.eup %1083  ;;  %v697_v23 = vmul.f32 0.6931472, %v1082_v41 }
 0x315   : > { %v1086_v24 = vpop.eup %1085  ;;  %v699_v0 = vmul.f32 0.6931472, %v1084_v9 }
 0x316   : > { %v1088_v27 = vpop.eup %1087  ;;  %v701_v45 = vmul.f32 0.6931472, %v1086_v24  ;;  %v1602_v28 = vsub.f32 %v672_v63, %v697_v23  ;;  %v664_v24 = vld [vmem:[%s1775_s2 + $0x20] sm:$0xff] }
 0x317   : > { %v703_v29 = vmul.f32 0.6931472, %v1088_v27  ;;  %v1604_v46 = vsub.f32 %v673_v22, %v699_v0 }
 0x318   : > { %v1606_v7 = vsub.f32 %v674_v59, %v701_v45  ;;  %v708_v30 = vmul.f32 1.442695, %v1602_v28  ;;  %v667_v45 = vld [vmem:[%s1775_s2 + $0x38] sm:$0xff] }
 0x319   : > { %v1609_v42 = vsub.f32 %v675_v43, %v703_v29  ;;  %v710_v44 = vmul.f32 1.442695, %v1604_v46 }
 0x31a   : > { %1089 = vpow2.f32 %v708_v30  ;;  %v712_v52 = vmul.f32 1.442695, %v1606_v7 }
 0x31b   : > { %1091 = vpow2.f32 %v710_v44  ;;  %v714_v57 = vmul.f32 1.442695, %v1609_v42  ;;  %v800_v44 = vsub.f32 0.0, %v661_v19 }
 0x31c   : > { %1093 = vpow2.f32 %v712_v52  ;;  %v1170_v52 = vmov 32.0  }
 0x31d   : > { %1095 = vpow2.f32 %v714_v57  ;;  %v670_v57 = vld [vmem:[%s1775_s2 + $0x50] sm:$0xff] }
 0x320   : > { %v1090_v50 = vpop.eup %1089 }
 0x321   : > { %v1092_v31 = vpop.eup %1091  ;;  %v1614_v32 = vsub.f32 1.0, %v1090_v50 }
 0x322   : > { %v1094_v40 = vpop.eup %1093  ;;  %v1616_v8 = vsub.f32 1.0, %v1092_v31 }
 0x323   : > { %v1096_v51 = vpop.eup %1095  ;;  %v1618_v49 = vsub.f32 1.0, %v1094_v40  ;;  %1097 = vrsqrt.f32 %v1614_v32  ;;  %v1647_v61 = vmul.f32 %v1614_v32, %v1614_v32  ;;  %vm743_vm1 = vcmp.eq.f32.partialorder %v1614_v32, inf }
 0x324   : > { %v1621_v48 = vsub.f32 1.0, %v1096_v51  ;;  %1099 = vrsqrt.f32 %v1616_v8  ;;  %v721_v35 = vmul.f32 %v1616_v8, %v1616_v8  ;;  %vm745_vm4 = vcmp.eq.f32.partialorder %v1614_v32, 0.0 }
 0x325   : > { %1101 = vrsqrt.f32 %v1618_v49  ;;  %v746_v1 = vand.u32 2147483648, %v1614_v32  ;;  %v722_v36 = vmul.f32 %v1618_v49, %v1618_v49  ;;  %vm755_vm10 = vcmp.eq.f32.partialorder %v1616_v8, inf }
 0x326   : > { %1103 = vrsqrt.f32 %v1621_v48  ;;  %v723_v38 = vmul.f32 %v1621_v48, %v1621_v48  ;;  %vm757_vm11 = vcmp.eq.f32.partialorder %v1616_v8, 0.0  ;;  %v758_v18 = vand.u32 2147483648, %v1616_v8 }
 0x327   : > { %vm767_vm7 = vcmp.eq.f32.partialorder %v1618_v49, inf  ;;  %vm769_vm8 = vcmp.eq.f32.partialorder %v1618_v49, 0.0  ;;  %v770_v13 = vand.u32 2147483648, %v1618_v49  ;;  %vm779_vm14 = vcmp.eq.f32.partialorder %v1621_v48, inf }
 0x328   : > { %v782_v23 = vand.u32 2147483648, %v1621_v48  ;;  %1105 = vrcp.f32 %v1170_v52 }
 0x329   : > { %v1098_v33 = vpop.eup %1097 }
 0x32a   : > { %v737_v60 = vmul.f32 %v1098_v33, %v1614_v32  ;;  %v1100_v47 = vpop.eup %1099 }
 0x32b   : > { %v1102_v62 = vpop.eup %1101  ;;  %v749_v53 = vmul.f32 %v1100_v47, %v1616_v8 }
 0x32c   : > { %v738_v14 = vmul.f32 %v1098_v33, %v737_v60  ;;  %v1104_v56 = vpop.eup %1103  ;;  %v761_v3 = vmul.f32 %v1102_v62, %v1618_v49 }
 0x32d   : > { %v750_v15 = vmul.f32 %v1100_v47, %v749_v53  ;;  %v773_v54 = vmul.f32 %v1104_v56, %v1621_v48 }
 0x32e   : > { %v739_v6 = vmul.f32 0.5, %v738_v14  ;;  %v762_v11 = vmul.f32 %v1102_v62, %v761_v3  ;;  %v802_v3 = vsub.f32 0.0, %v667_v45 }
 0x32f   : > { %v751_v34 = vmul.f32 0.5, %v750_v15  ;;  %v774_v55 = vmul.f32 %v1104_v56, %v773_v54  ;;  %v803_v54 = vsub.f32 0.0, %v670_v57 }
 0x330   : > { %v740_v20 = vsub.f32 1.5, %v739_v6  ;;  %v763_v21 = vmul.f32 0.5, %v762_v11 }
 0x331   : > { %v752_v58 = vsub.f32 1.5, %v751_v34  ;;  %v775_v16 = vmul.f32 0.5, %v774_v55 }
 0x332   : > { %v741_v37 = vmul.f32 %v1098_v33, %v740_v20  ;;  %v764_v25 = vsub.f32 1.5, %v763_v21  ;;  %v1106_v20 = vpop.eup %1105 }
 0x333   : > { %v753_v17 = vmul.f32 %v1100_v47, %v752_v58  ;;  %v776_v39 = vsub.f32 1.5, %v775_v16 }
 0x334   : > { %v742_v5 = vmul.f32 %v741_v37, %v1614_v32  ;;  %v765_v26 = vmul.f32 %v1102_v62, %v764_v25  ;;  %v801_v62 = vsub.f32 0.0, %v664_v24  ;;  %v822_v37 = vmul.f32 32.0, %v1106_v20 }
 0x335   : > { %v754_v41 = vmul.f32 %v753_v17, %v1616_v8  ;;  %v777_v22 = vmul.f32 %v1104_v56, %v776_v39 }
 0x336   : > { %v744_v63 = vsel %vm743_vm1, %v1614_v32, %v742_v5  ;;  %v766_v59 = vmul.f32 %v765_v26, %v1618_v49  ;;  %vm781_vm1 = vcmp.eq.f32.partialorder %v1621_v48, 0.0 }
 0x337   : > { %v747_v9 = vsel %vm745_vm4, %v746_v1, %v744_v63  ;;  %v756_v43 = vsel %vm755_vm10, %v1616_v8, %v754_v41  ;;  %v778_v0 = vmul.f32 %v777_v22, %v1621_v48 }
 0x338   : > { %v784_v27 = vmul.f32 %v747_v9, %v1647_v61  ;;  %v759_v29 = vsel %vm757_vm11, %v758_v18, %v756_v43  ;;  %v768_v30 = vsel %vm767_vm7, %v1618_v49, %v766_v59 }
 0x339   : > { %v771_v50 = vsel %vm769_vm8, %v770_v13, %v768_v30  ;;  %v780_v31 = vsel %vm779_vm14, %v1621_v48, %v778_v0  ;;  %v785_v40 = vmul.f32 %v759_v29, %v721_v35 }
 0x33a   : > { %v788_v51 = vsel %vm732_vm15, %v1647_v61, %v784_v27  ;;  %v783_v33 = vsel %vm781_vm1, %v782_v23, %v780_v31  ;;  %v786_v60 = vmul.f32 %v771_v50, %v722_v36  ;;  %vm1779_vm15 = vcmp.eq.f32.partialorder %v1643_v10, 1.0 }
 0x33b   : > { %v792_v47 = vsel %vm728_vm0, %v1614_v32, %v788_v51  ;;  %v787_v14 = vmul.f32 %v783_v33, %v723_v38  ;;  %v789_v53 = vsel %vm733_vm3, %v721_v35, %v785_v40  ;;  %vm1780_vm0 = vcmp.eq.f32.partialorder %v1637_v4, 0.0 }
 0x33c   : > { %v796_v56 = vsel %vm724_vm2, 1.0, %v792_v47  ;;  %v790_v6 = vsel %vm734_vm6, %v722_v36, %v786_v60  ;;  %v793_v15 = vsel %vm729_vm5, %v1616_v8, %v789_v53  ;;  %vm1781_vm2 = vcmp.eq.f32.partialorder %v1653_v12, 0.0 }
 0x33d   : > { %v804_v61 = vmul.f32 %v800_v44, %v796_v56  ;;  %v791_v32 = vsel %vm735_vm9, %v723_v38, %v787_v14  ;;  %v794_v11 = vsel %vm1779_vm15, %v1618_v49, %v790_v6  ;;  %v797_v2 = vsel %vm1780_vm0, 1.0, %v793_v15 }
 0x33e   : > { %v795_v34 = vsel %vm731_vm13, %v1621_v48, %v791_v32  ;;  %v798_v8 = vsel %vm726_vm12, 1.0, %v794_v11  ;;  %v805_v55 = vmul.f32 %v801_v62, %v797_v2  ;;  %v823_v10 = vsub.f32 1.0, %v822_v37 }
 0x33f   : > { %v808_v35 = vmul.f32 %v804_v61, %v1602_v28  ;;  %v799_v1 = vsel %vm1781_vm2, 1.0, %v795_v34  ;;  %v806_v21 = vmul.f32 %v802_v3, %v798_v8  ;;  %vm826_vm3 = vweird.f32 %v1106_v20 }
 0x340   : > { %v807_v36 = vmul.f32 %v803_v54, %v799_v1  ;;  %v809_v49 = vmul.f32 %v805_v55, %v1604_v46  ;;  %v824_v28 = vmul.f32 %v1106_v20, %v823_v10 }
 0x341   : > { %v810_v4 = vmul.f32 %v806_v21, %v1606_v7  ;;  %v829_v7 = vld [vmem:[%s1333_s29] sm:$0x1] }
 0x342   : > { %v811_v58 = vmul.f32 %v807_v36, %v1609_v42  ;;  %v812_v48 = vadd.f32 %v809_v49, %v808_v35  ;;  %v825_v17 = vadd.f32 %v1106_v20, %v824_v28 }
 0x344   : > { %v813_v16 = vadd.f32 %v812_v48, %v810_v4  ;;  %v827_v46 = vsel %vm826_vm3, %v1106_v20, %v825_v17 }
 0x346   : > { %v814_v38 = vadd.f32 %v813_v16, %v811_v58 }
 0x348   : > { %v815_v25 = vrot.slane %v814_v38, 4 }
 0x34a   : > { %v816_v5 = vadd.f32 %v815_v25, %v814_v38 }
 0x34c   : > { %v817_v12 = vrot.slane %v816_v5, 2 }
 0x34e   : > { %v818_v18 = vadd.f32 %v817_v12, %v816_v5 }
 0x350   : > { %v819_v39 = vrot.slane %v818_v18, 1 }
 0x352   : > { %v820_v26 = vadd.f32 %v819_v39, %v818_v18 }
 0x354   : > { %v828_v13 = vmul.f32 %v827_v46, %v820_v26 }
 0x356   : > { %v830_v19 = vadd.f32 %v829_v7, %v828_v13 }
 0x358   : > { %831 = vst [vmem:[%s1333_s29] sm:$0x1] %v830_v19 }
 0x359 PF: > { %s13_s18 = sadd.s32 1, %s1161_s18   ;;  %s1782_s12 = smov %s1141_s13 }
 0x35a   : > { %p10_p3 = scmp.ge.s32.totalorder %s13_s18, 6   ;;  %s1783_s13 = smov %s1242_s25 }
 0x35b   : > { %s1784_s14 = smov %s1153_s16  ;;  %s1785_s15 = smov %s1157_s17 }
 0x35c   : > { %s1786_s16 = smov %s1789_s19  ;;  %s1787_s17 = smov %s1793_s20 }
 0x35d   :  { %12 = sbr.rel (!%p10_p3) target bundleno = 4 (0x4), region = 105 }

</bundles_post_ra>
